<compile_context>
chip_gen: v5e
topology: v5e:2x2
jax: 0.10.0
libtpu: 0.0.40
codegen_flags: <defaults>
</compile_context>

<pallas_src>
import functools
import math

import jax
import jax.numpy as jnp
from jax.experimental import pallas as pl
from jax.experimental.pallas import tpu as pltpu

_LANES = 128
_SUBLANES = 8
_MAX_BLOCK_ROWS = 2048   # 2048 x 128 x 4 B = 1 MiB per f32 block buffer
_SPLIT_MIN_ROWS = 1024   # below 512 KiB, splitting the grid only adds per-step overhead


def _ceil_div(a: int, b: int) -> int:
    return -(-a // b)


def _choose_tiling(rows: int):
    """Pick (block_rows, grid_rows): big streaming blocks, even/balanced grid."""
    if rows <= _SPLIT_MIN_ROWS:
        return rows, 1                               # single block == full array
    # Even grid (balances v7x's two TensorCores under dimension_semantics="parallel"),
    # balanced block sizes, each block <= _MAX_BLOCK_ROWS.
    pairs = _ceil_div(rows, 2 * _MAX_BLOCK_ROWS)
    grid = 2 * pairs
    block_rows = _ceil_div(_ceil_div(rows, grid), _SUBLANES) * _SUBLANES
    grid = _ceil_div(rows, block_rows)               # partial last block is clipped
    return block_rows, grid


def _tau_kernel(w_ref, *out_refs, alpha_min, delta, compute_alpha, compute_tau):
    """Elementwise VPU/EUP hot path: sigmoid + lerp (+ optional -1/log fusion)."""
    w = w_ref[...].astype(jnp.float32)               # upcast in-kernel (weight may be bf16)
    coef = 1.0 / (1.0 + jnp.exp(-w))                 # sigmoid; exp runs on the EUP
    alpha = alpha_min + delta * coef                 # one mul + one add per element
    idx = 0
    if compute_alpha:                                # static flags -> dead outputs never built
        out_refs[idx][...] = alpha.astype(out_refs[idx].dtype)
        idx += 1
    if compute_tau:
        out_refs[idx][...] = (-1.0 / jnp.log(alpha)).astype(out_refs[idx].dtype)


def _run(weight, alpha_min, delta, *, compute_alpha, compute_tau, out_dtype):
    """Reshape weight into a lane-dense (rows, 128) slab and run the tiled kernel."""
    n = weight.shape[0]
    rows = _ceil_div(_ceil_div(n, _LANES), _SUBLANES) * _SUBLANES
    n_slab = rows * _LANES

    if n_slab == n:
        w2d = weight.reshape(rows, _LANES)                       # free reshape, no copy
    else:
        # Pad only to the next (8,128) multiple, NOT to a whole-block multiple.
        w2d = jnp.pad(weight, (0, n_slab - n)).reshape(rows, _LANES)

    block_rows, grid_rows = _choose_tiling(rows)

    n_out = int(compute_alpha) + int(compute_tau)
    out_shape = tuple(
        jax.ShapeDtypeStruct((rows, _LANES), out_dtype) for _ in range(n_out))
    out_specs = tuple(
        pl.BlockSpec((block_rows, _LANES), lambda i: (i, 0)) for _ in range(n_out))

    # Double-buffered working set: (input + outputs) x 2 buffers x block bytes (+ margin).
    blk_bytes = block_rows * _LANES * (
        jnp.dtype(weight.dtype).itemsize + n_out * jnp.dtype(out_dtype).itemsize)
    vmem_limit = min(32 * 1024 * 1024, max(16 * 1024 * 1024, 2 * blk_bytes + (2 << 20)))

    outs = pl.pallas_call(
        functools.partial(_tau_kernel, alpha_min=alpha_min, delta=delta,
                          compute_alpha=compute_alpha, compute_tau=compute_tau),
        out_shape=out_shape,
        grid_spec=pltpu.PrefetchScalarGridSpec(
            num_scalar_prefetch=0,
            grid=(grid_rows,),
            in_specs=[pl.BlockSpec((block_rows, _LANES), lambda i: (i, 0))],
            out_specs=out_specs,
        ),
        compiler_params=pltpu.CompilerParams(
            dimension_semantics=("parallel",),
            vmem_limit_bytes=vmem_limit),
    )(w2d)

    # For non-(8*128)-aligned n this slice is an extra (tiny) copy; it is jitted
    # together with the kernel, and consumers that accept the padded slab can
    # skip it entirely by calling _run directly.
    return tuple(o.reshape(-1)[:n] for o in outs)


@functools.lru_cache(maxsize=None)
def _make(dt, tau_min, tau_max, compute_alpha, compute_tau, out_dtype):
    # Mirrors the torch module's register_buffer('alpha_min'/'alpha_max', ...):
    # derived once per hyper-parameter set, baked in as compile-time constants.
    alpha_min = math.exp(-dt / tau_min)
    alpha_max = math.exp(-dt / tau_max)
    delta = alpha_max - alpha_min

    @jax.jit
    def fn(weight):
        return _run(weight, alpha_min, delta, compute_alpha=compute_alpha,
                    compute_tau=compute_tau, out_dtype=out_dtype)

    return fn


def interpolation_exp_sigmoid_forward(weight, dt, tau_min, tau_max,
                                      out_dtype=jnp.float32):
    """Equivalent of InterpolationExpSigmoidTrainer.forward(); returns alpha (in_features,)."""
    (alpha,) = _make(float(dt), float(tau_min), float(tau_max),
                     True, False, out_dtype)(weight)
    return alpha


def get_tau(weight, dt, tau_min, tau_max, out_dtype=jnp.float32):
    """Equivalent of get_tau(): only tau is written to HBM (alpha output elided)."""
    (tau,) = _make(float(dt), float(tau_min), float(tau_max),
                   False, True, out_dtype)(weight)
    return tau


def interpolation_exp_sigmoid_forward_and_tau(weight, dt, tau_min, tau_max,
                                              out_dtype=jnp.float32):
    """Fused (alpha, tau): weight is read from HBM once, one kernel launch."""
    alpha, tau = _make(float(dt), float(tau_min), float(tau_max),
                       True, True, out_dtype)(weight)
    return alpha, tau


def get_decay(weight, dt, tau_min, tau_max, out_dtype=jnp.float32):
    """Equivalent of TauTrainer.get_decay() -> forward()."""
    return interpolation_exp_sigmoid_forward(weight, dt, tau_min, tau_max, out_dtype)


if __name__ == "__main__":
    in_features = 32
    dt, tau_min, tau_max = 1.0, 2.0, 20.0

    # TODO(synk): reset_parameters / apply_parameter_constraints are host-side
    # parameter management; init is reproduced here with jax.random.uniform(-1, 1).
    key = jax.random.PRNGKey(0)
    weight = jax.random.uniform(key, (in_features,), jnp.float32, -1.0, 1.0)

    alpha = jax.block_until_ready(
        interpolation_exp_sigmoid_forward(weight, dt, tau_min, tau_max))
    tau = jax.block_until_ready(get_tau(weight, dt, tau_min, tau_max))
    alpha2, tau2 = interpolation_exp_sigmoid_forward_and_tau(weight, dt, tau_min, tau_max)
    jax.block_until_ready((alpha2, tau2))

    # Plain-JAX reference (same formulation as the torch module).
    a_min = jnp.exp(-dt / jnp.float32(tau_min))
    a_max = jnp.exp(-dt / jnp.float32(tau_max))
    coef = jax.nn.sigmoid(weight)
    ref_alpha = a_max * coef + (1.0 - coef) * a_min
    ref_tau = -1.0 / jnp.log(ref_alpha)

    assert alpha.shape == (in_features,)
    assert jnp.allclose(alpha, ref_alpha, atol=1e-6, rtol=1e-6), (alpha, ref_alpha)
    assert jnp.allclose(tau, ref_tau, atol=1e-4, rtol=1e-4), (tau, ref_tau)
    assert jnp.allclose(alpha2, ref_alpha, atol=1e-6, rtol=1e-6)
    assert jnp.allclose(tau2, ref_tau, atol=1e-4, rtol=1e-4)

    # Exercise the multi-block even-grid path (grid_rows == 2) and the
    # non-(8*128)-aligned padding + partial-last-block path.
    big = jax.random.uniform(jax.random.PRNGKey(1), (300_000,), jnp.float32, -1.0, 1.0)
    big_alpha, big_tau = interpolation_exp_sigmoid_forward_and_tau(big, dt, tau_min, tau_max)
    jax.block_until_ready((big_alpha, big_tau))
    coef_b = jax.nn.sigmoid(big)
    ref_big_alpha = a_max * coef_b + (1.0 - coef_b) * a_min
    ref_big_tau = -1.0 / jnp.log(ref_big_alpha)
    assert big_alpha.shape == big.shape
    assert jnp.allclose(big_alpha, ref_big_alpha, atol=1e-6, rtol=1e-6)
    assert jnp.allclose(big_tau, ref_big_tau, atol=1e-4, rtol=1e-4)

    print("KERNEL_OK")
</pallas_src>

<mosaic_0001>
module attributes {stable_mosaic.version = 11 : i64} {
  func.func @_tau_kernel(%arg0: i32, %arg1: memref<8x128xf32, #tpu.memory_space<vmem>>, %arg2: memref<8x128xf32, #tpu.memory_space<vmem>>) attributes {dimension_semantics = [#tpu.dimension_semantics<parallel>], iteration_bounds = array<i64: 1>, scalar_prefetch = 0 : i64, scratch_operands = 0 : i64, tpu.core_type = #tpu.core_type<tc>, window_params = [{transform_indices = @transform_0, window_bounds = array<i64: 8, 128>}, {transform_indices = @transform_1, window_bounds = array<i64: 8, 128>}]} {
    %c0 = arith.constant 0 : index
    %c0_0 = arith.constant 0 : index
    %0 = vector.load %arg1[%c0, %c0_0] : memref<8x128xf32, #tpu.memory_space<vmem>>, vector<8x128xf32>
    %cst = arith.constant 0.000000e+00 : f32
    %1 = vector.broadcast %cst : f32 to vector<8x128xf32>
    %2 = arith.subf %1, %0 : vector<8x128xf32>
    %3 = math.exp %2 : vector<8x128xf32>
    %cst_1 = arith.constant 1.000000e+00 : f32
    %4 = vector.broadcast %cst_1 : f32 to vector<8x128xf32>
    %5 = arith.addf %4, %3 : vector<8x128xf32>
    %cst_2 = arith.constant 1.000000e+00 : f32
    %6 = vector.broadcast %cst_2 : f32 to vector<8x128xf32>
    %7 = arith.divf %6, %5 : vector<8x128xf32>
    %cst_3 = arith.constant 0.344698757 : f32
    %8 = vector.broadcast %cst_3 : f32 to vector<8x128xf32>
    %9 = arith.mulf %8, %7 : vector<8x128xf32>
    %cst_4 = arith.constant 0.606530666 : f32
    %10 = vector.broadcast %cst_4 : f32 to vector<8x128xf32>
    %11 = arith.addf %10, %9 : vector<8x128xf32>
    %c0_5 = arith.constant 0 : index
    %c0_6 = arith.constant 0 : index
    %12 = vector.load %arg2[%c0_5, %c0_6] : memref<8x128xf32, #tpu.memory_space<vmem>>, vector<8x128xf32>
    tpu.vector_store %arg2[%c0_5, %c0_6], %11 {strides = array<i32>} : memref<8x128xf32, #tpu.memory_space<vmem>>, vector<8x128xf32>,
    return
  }
  func.func @transform_0(%arg0: i32) -> (i32, i32) {
    %c0_i32 = arith.constant 0 : i32
    %c0_i32_0 = arith.constant 0 : i32
    return %arg0, %c0_i32 : i32, i32
  }
  func.func @transform_1(%arg0: i32) -> (i32, i32) {
    %c0_i32 = arith.constant 0 : i32
    %c0_i32_0 = arith.constant 0 : i32
    return %arg0, %c0_i32 : i32, i32
  }
}

</mosaic_0001>

<bundles_post_ra>
// kernel: fn.1
= control target key start
LH: loop header
LB: loop body
LE: loop exit
PB: predicated region body
PF: predicated region fallthrough
CT: control target
= control target key end

     0   :  { %s55_s0 = inlined_call_operand.vmem [shape: f32[8,128], index: 0, kind: input, shape index: {}]   ;;  %s56_s1 = inlined_call_operand.vmem [shape: f32[8,128], index: 1, kind: output, shape index: {}]  }
   0x1   :  { %v8_v0 = vld [vmem:[%s55_s0] sm:$0xff] }
   0x2   :  { %v9_v1 = vsub.f32 0.0, %v8_v0 }
   0x4   :  { %v10_v2 = vmul.f32 1.442695, %v9_v1 }
   0x6   :  { %35 = vpow2.f32 %v10_v2 }
   0xc   :  { %v36_v3 = vpop.eup %35 }
   0xd   :  { %v12_v4 = vadd.f32 1.0, %v36_v3 }
   0xf   :  { %37 = vrcp.f32 %v12_v4  ;;  %v24_v7 = vand.u32 2147483648, %v12_v4  ;;  %vm18_vm0 = vweird.f32 %v12_v4  ;;  %v22_v9 = vand.u32 2147483647, %v12_v4 }
  0x11   :  { %v25_v11 = vor.u32 1.1754944e-38, %v24_v7  ;;  %vm23_vm3 = vcmp.eq.f32.partialorder %v22_v9, 8.507059e+37 }
  0x15   :  { %v38_v5 = vpop.eup %37 }
  0x16   :  { %v14_v6 = vmul.f32 %v38_v5, %v12_v4  ;;  %vm19_vm1 = vweird.f32 %v38_v5 }
  0x17   :  { %vm20_vm2 = vmor %vm18_vm0, %vm19_vm1 }
  0x18   :  { %v15_v8 = vsub.f32 1.0, %v14_v6 }
  0x1a   :  { %v16_v10 = vmul.f32 %v38_v5, %v15_v8 }
  0x1c   :  { %v17_v12 = vadd.f32 %v38_v5, %v16_v10 }
  0x1e   :  { %v21_v13 = vsel %vm20_vm2, %v38_v5, %v17_v12 }
  0x1f   :  { %v26_v14 = vsel %vm23_vm3, %v25_v11, %v21_v13 }
  0x20   :  { %v28_v15 = vmul.f32 0.34469876, %v26_v14 }
  0x22   :  { %v29_v16 = vadd.f32 0.60653067, %v28_v15 }
  0x24   :  { %30 = vst [vmem:[%s56_s1] sm:$0xff] %v29_v16 }

</bundles_post_ra>
